<compile_context>
chip_gen: v7x
topology: tpu7x:2x2x1
jax: 0.10.0
libtpu: 0.0.40
codegen_flags: <defaults>
</compile_context>

<pallas_src>
import math

import jax
import jax.numpy as jnp
from jax.experimental import pallas as pl
from jax.experimental.pallas import tpu as pltpu


# ----------------------------- Pallas kernel ------------------------------- #
def _linear_bias_kernel(x_ref, w_ref, b_ref, o_ref):
    # x_ref: (tm, C) bf16   w_ref: (C, tn) bf16   b_ref: (1, tn) f32
    # o_ref: (tm, tn) out dtype.  MXU matmul with f32 accumulation.
    acc = jnp.dot(x_ref[...], w_ref[...], preferred_element_type=jnp.float32)
    o_ref[...] = (acc + b_ref[...]).astype(o_ref.dtype)


# ------------------------------ tiling logic -------------------------------- #
def _pick_tiles(M, C, OUT, x_bytes, w_bytes, o_bytes,
                budget=24 * 1024 * 1024):
    """Pick (row_tile, out_tile) under a double-buffered VMEM budget.

    budget ~24 MiB keeps the footprint inside the 32 MiB scoped limit on every
    generation (v7x has only 64 MiB physical VMEM and everything is
    double-buffered by the BlockSpec pipeline).
    """
    # OUT tile: keep the whole (padded, 128-multiple) OUT resident while it is
    # small; split into lane-dense 128-multiples once the weight block grows.
    tn = OUT
    while tn > 2048 and tn % 2 == 0 and (tn // 2) % 128 == 0:
        tn //= 2

    if M <= 512:
        # Single full-extent row block (allowed by the (8,128) rule).
        return M, tn

    def footprint(tm):
        return 2 * (tm * C * x_bytes + C * tn * w_bytes + tm * tn * o_bytes)

    # Biggest row tile that fits; M > 512 guarantees grid length >= 2 so the
    # "parallel" row axis can shard across both TensorCores on v7x.
    tm = 512
    while tm > 128 and footprint(tm) > budget:
        tm //= 2
    return tm, tn


def _pad_cols(a, mult=128):
    """Zero-pad the last dim of a 2-D array up to a multiple of `mult`."""
    pad = (-a.shape[-1]) % mult
    if pad:
        a = jnp.pad(a, ((0, 0), (0, pad)))
    return a


# ------------------------------ GEMM wrapper -------------------------------- #
def pallas_linear(x_flat, w_t, bias2d, *, out_dtype):
    """y = x_flat @ w_t + bias2d  ->  (M, OUT) in out_dtype.

    x_flat : (M, C)   (typically bf16)
    w_t    : (C, OUT) pre-transposed weight, OUT % 128 == 0
    bias2d : (1, OUT) float32
    """
    M, C = x_flat.shape
    Cw, OUT = w_t.shape
    assert Cw == C, "weight / input contraction mismatch"
    assert OUT % 128 == 0, "OUT must be padded to a multiple of 128"

    x_bytes = jnp.dtype(x_flat.dtype).itemsize
    w_bytes = jnp.dtype(w_t.dtype).itemsize
    o_bytes = jnp.dtype(out_dtype).itemsize
    tm, tn = _pick_tiles(M, C, OUT, x_bytes, w_bytes, o_bytes)

    # Pad the token axis up to a tile multiple instead of shrinking the tile
    # (tiny tiles kill HBM utilisation); padded rows are sliced off below.
    Mp = pl.cdiv(M, tm) * tm
    if Mp != M:
        x_flat = jnp.pad(x_flat, ((0, Mp - M), (0, 0)))

    grid = (Mp // tm, OUT // tn)

    cost = pl.CostEstimate(
        flops=2 * Mp * C * OUT,
        transcendentals=0,
        bytes_accessed=(Mp * C * x_bytes + C * OUT * w_bytes
                        + OUT * 4 + Mp * OUT * o_bytes),
    )

    y = pl.pallas_call(
        _linear_bias_kernel,
        out_shape=jax.ShapeDtypeStruct((Mp, OUT), out_dtype),
        grid_spec=pltpu.PrefetchScalarGridSpec(
            num_scalar_prefetch=0,
            grid=grid,
            in_specs=[
                pl.BlockSpec((tm, C), lambda i, j: (i, 0)),   # x rows, full K
                pl.BlockSpec((C, tn), lambda i, j: (0, j)),   # weight OUT tile
                pl.BlockSpec((1, tn), lambda i, j: (0, j)),   # bias OUT tile
            ],
            out_specs=pl.BlockSpec((tm, tn), lambda i, j: (i, j)),
        ),
        compiler_params=pltpu.CompilerParams(
            dimension_semantics=("parallel", "parallel"),
            vmem_limit_bytes=32 * 1024 * 1024,
        ),
        cost_estimate=cost,
    )(x_flat, w_t, bias2d)

    return y[:M] if Mp != M else y


# --------------------------- module equivalent ------------------------------ #
class LinearProjectionPallas:
    """JAX/Pallas equivalent of uformer LinearProjection.

    Parameters follow nn.Linear conventions (weight (out, in), bias (out,),
    y = x @ W^T + b), uniform(-k, k) init with k = 1/sqrt(dim).  Kernel-side
    copies are stored pre-transposed (C, OUT), cast to `compute_dtype`
    (bf16 -> MXU-native, half the HBM bytes) and zero-padded so OUT is a
    multiple of 128.  The f32 master copies are kept for the reference.
    """

    def __init__(self, dim, heads=8, dim_head=64, bias=True, key=None,
                 dtype=jnp.float32, compute_dtype=jnp.bfloat16):
        inner_dim = dim_head * heads
        self.dim = dim
        self.heads = heads
        self.dim_head = dim_head
        self.inner_dim = inner_dim
        self.compute_dtype = compute_dtype

        if key is None:
            key = jax.random.PRNGKey(0)
        kq_w, kq_b, kkv_w, kkv_b = jax.random.split(key, 4)
        bound = 1.0 / math.sqrt(dim)
        self.wq = jax.random.uniform(kq_w, (inner_dim, dim), dtype, -bound, bound)
        self.bq = (jax.random.uniform(kq_b, (inner_dim,), dtype, -bound, bound)
                   if bias else jnp.zeros((inner_dim,), dtype))
        self.wkv = jax.random.uniform(kkv_w, (inner_dim * 2, dim), dtype, -bound, bound)
        self.bkv = (jax.random.uniform(kkv_b, (inner_dim * 2,), dtype, -bound, bound)
                    if bias else jnp.zeros((inner_dim * 2,), dtype))

        # Kernel-side copies: pre-transposed, pre-cast, OUT padded to 128.
        cd = compute_dtype
        self.wq_t = _pad_cols(self.wq.T).astype(cd)                   # (C, pad(inner))
        self.bq_pad = _pad_cols(self.bq.reshape(1, -1)).astype(jnp.float32)
        self.wkv_t = _pad_cols(self.wkv.T).astype(cd)                 # (C, pad(2*inner))
        self.bkv_pad = _pad_cols(self.bkv.reshape(1, -1)).astype(jnp.float32)
        # Fused [q | k | v] projection for the self-attention path.
        self.wqkv_t = _pad_cols(
            jnp.concatenate([self.wq.T, self.wkv.T], axis=1)).astype(cd)
        self.bqkv_pad = _pad_cols(
            jnp.concatenate([self.bq, self.bkv]).reshape(1, -1)).astype(jnp.float32)

    def __call__(self, x, attn_kv=None):
        B, N, C = x.shape
        H = self.heads
        dh = C // H          # matches PyTorch: reshape uses C // heads
        inner = self.inner_dim
        cd = self.compute_dtype
        # Same implicit constraint as the PyTorch module's reshape.
        assert inner == H * dh, "LinearProjection requires inner_dim == C"

        if attn_kv is None:
            # Self-attention: one fused GEMM, one pass over x.
            y = pallas_linear(x.reshape(B * N, C).astype(cd),
                              self.wqkv_t, self.bqkv_pad, out_dtype=x.dtype)
            q_flat = y[:, :inner]
            kv_flat = y[:, inner:3 * inner]
            N_kv = N
        else:
            # attn_kv: (N_kv, C), shared across the batch.  PyTorch repeats it
            # over B before the Linear; rows are identical, so project once and
            # broadcast the result (numerically identical, B x less GEMM work).
            N_kv = attn_kv.shape[0]
            q_flat = pallas_linear(x.reshape(B * N, C).astype(cd),
                                   self.wq_t, self.bq_pad,
                                   out_dtype=x.dtype)[:, :inner]
            kv_once = pallas_linear(attn_kv.astype(cd),
                                    self.wkv_t, self.bkv_pad,
                                    out_dtype=x.dtype)[:, :2 * inner]
            kv_flat = jnp.broadcast_to(
                kv_once[None], (B, N_kv, 2 * inner)).reshape(B * N_kv, 2 * inner)

        # Glue: reshape / permute exactly as the PyTorch module.
        q = q_flat.reshape(B, N, 1, H, dh).transpose(2, 0, 3, 1, 4)[0]
        kv = kv_flat.reshape(B, N_kv, 2, H, dh).transpose(2, 0, 3, 1, 4)
        return q, kv[0], kv[1]


# ------------------------------ reference ----------------------------------- #
def reference_forward(module, x, attn_kv=None):
    """Plain-JAX f32 reference matching the PyTorch module."""
    B, N, C = x.shape
    H = module.heads
    dh = C // H
    if attn_kv is not None:
        attn_kv = jnp.broadcast_to(attn_kv[None], (B, attn_kv.shape[0], C))
    else:
        attn_kv = x
    N_kv = attn_kv.shape[1]
    qf = x @ module.wq.T + module.bq
    kvf = attn_kv @ module.wkv.T + module.bkv
    q = qf.reshape(B, N, 1, H, dh).transpose(2, 0, 3, 1, 4)[0]
    kv = kvf.reshape(B, N_kv, 2, H, dh).transpose(2, 0, 3, 1, 4)
    return q, kv[0], kv[1]


if __name__ == "__main__":
    # Config 1: small self-attention + cross-attention (dim = heads*dim_head).
    heads, dim_head = 2, 16
    dim = heads * dim_head            # C = 32
    B, N = 2, 8

    key = jax.random.PRNGKey(0)
    kx, kkv, kp, kp2, kx2 = jax.random.split(key, 5)
    x = jax.random.normal(kx, (B, N, dim), dtype=jnp.float32)
    attn_kv = jax.random.normal(kkv, (N, dim), dtype=jnp.float32)

    module = LinearProjectionPallas(dim, heads=heads, dim_head=dim_head,
                                    bias=True, key=kp)

    # Self-attention path (fused q|k|v GEMM).
    q, k, v = module(x)
    jax.block_until_ready((q, k, v))
    q_ref, k_ref, v_ref = reference_forward(module, x)
    assert q.shape == (B, heads, N, dim_head)
    assert k.shape == (B, heads, N, dim_head)
    assert v.shape == (B, heads, N, dim_head)
    # bf16 operands / f32 accumulation vs full-f32 reference.
    assert jnp.allclose(q, q_ref, atol=5e-2, rtol=5e-2)
    assert jnp.allclose(k, k_ref, atol=5e-2, rtol=5e-2)
    assert jnp.allclose(v, v_ref, atol=5e-2, rtol=5e-2)

    # Cross-attention path (separate q / kv projections).
    qc, kc, vc = module(x, attn_kv)
    jax.block_until_ready((qc, kc, vc))
    qc_r, kc_r, vc_r = reference_forward(module, x, attn_kv)
    assert jnp.allclose(qc, qc_r, atol=5e-2, rtol=5e-2)
    assert jnp.allclose(kc, kc_r, atol=5e-2, rtol=5e-2)
    assert jnp.allclose(vc, vc_r, atol=5e-2, rtol=5e-2)

    # Config 2: larger self-attention exercising row tiling + row padding
    # (B*N = 600 -> row tile 512, padded to 1024, 2-step parallel grid).
    heads2, dim_head2 = 4, 32
    dim2 = heads2 * dim_head2         # C = 128, fused OUT = 384
    B2, N2 = 2, 300
    x2 = jax.random.normal(kx2, (B2, N2, dim2), dtype=jnp.float32)
    module2 = LinearProjectionPallas(dim2, heads=heads2, dim_head=dim_head2,
                                     bias=True, key=kp2)
    q2, k2, v2 = module2(x2)
    jax.block_until_ready((q2, k2, v2))
    q2_r, k2_r, v2_r = reference_forward(module2, x2)
    assert q2.shape == (B2, heads2, N2, dim_head2)
    assert jnp.allclose(q2, q2_r, atol=5e-2, rtol=5e-2)
    assert jnp.allclose(k2, k2_r, atol=5e-2, rtol=5e-2)
    assert jnp.allclose(v2, v2_r, atol=5e-2, rtol=5e-2)

    print("KERNEL_OK")
</pallas_src>

<mosaic_0001>
module attributes {stable_mosaic.version = 11 : i64} {
  func.func @_linear_bias_kernel(%arg0: i32, %arg1: i32, %arg2: memref<16x32xbf16, #tpu.memory_space<vmem>>, %arg3: memref<32x128xbf16, #tpu.memory_space<vmem>>, %arg4: memref<1x128xf32, #tpu.memory_space<vmem>>, %arg5: memref<16x128xf32, #tpu.memory_space<vmem>>) attributes {dimension_semantics = [#tpu.dimension_semantics<parallel>, #tpu.dimension_semantics<parallel>], iteration_bounds = array<i64: 1, 1>, scalar_prefetch = 0 : i64, scratch_operands = 0 : i64, tpu.core_type = #tpu.core_type<tc>, window_params = [{transform_indices = @transform_0, window_bounds = array<i64: 16, 32>}, {transform_indices = @transform_1, window_bounds = array<i64: 32, 128>}, {transform_indices = @transform_2, window_bounds = array<i64: 1, 128>}, {transform_indices = @transform_3, window_bounds = array<i64: 16, 128>}]} {
    %c0 = arith.constant 0 : index
    %c0_0 = arith.constant 0 : index
    %0 = vector.load %arg2[%c0, %c0_0] : memref<16x32xbf16, #tpu.memory_space<vmem>>, vector<16x32xbf16>
    %c0_1 = arith.constant 0 : index
    %c0_2 = arith.constant 0 : index
    %1 = vector.load %arg3[%c0_1, %c0_2] : memref<32x128xbf16, #tpu.memory_space<vmem>>, vector<32x128xbf16>
    %cst = arith.constant dense<0.000000e+00> : vector<16x128xf32>
    %2 = tpu.matmul %0, %1, %cst {dimension_numbers = #tpu.dot_dimension_numbers<[1], [0], [0], [1], [0, 0, 1, 1], [], []>} : vector<16x32xbf16>, vector<32x128xbf16>, vector<16x128xf32> -> vector<16x128xf32>
    %c0_3 = arith.constant 0 : index
    %c0_4 = arith.constant 0 : index
    %3 = vector.load %arg4[%c0_3, %c0_4] : memref<1x128xf32, #tpu.memory_space<vmem>>, vector<1x128xf32>
    %4 = vector.broadcast %3 : vector<1x128xf32> to vector<16x128xf32>
    %5 = arith.addf %2, %4 : vector<16x128xf32>
    %c0_5 = arith.constant 0 : index
    %c0_6 = arith.constant 0 : index
    %6 = vector.load %arg5[%c0_5, %c0_6] : memref<16x128xf32, #tpu.memory_space<vmem>>, vector<16x128xf32>
    tpu.vector_store %arg5[%c0_5, %c0_6], %5 {strides = array<i32>} : memref<16x128xf32, #tpu.memory_space<vmem>>, vector<16x128xf32>,
    return
  }
  func.func @transform_0(%arg0: i32, %arg1: i32) -> (i32, i32) {
    %c0_i32 = arith.constant 0 : i32
    %c0_i32_0 = arith.constant 0 : i32
    return %arg0, %c0_i32 : i32, i32
  }
  func.func @transform_1(%arg0: i32, %arg1: i32) -> (i32, i32) {
    %c0_i32 = arith.constant 0 : i32
    %c0_i32_0 = arith.constant 0 : i32
    return %c0_i32, %arg1 : i32, i32
  }
  func.func @transform_2(%arg0: i32, %arg1: i32) -> (i32, i32) {
    %c0_i32 = arith.constant 0 : i32
    %c0_i32_0 = arith.constant 0 : i32
    return %c0_i32, %arg1 : i32, i32
  }
  func.func @transform_3(%arg0: i32, %arg1: i32) -> (i32, i32) {
    %c0_i32 = arith.constant 0 : i32
    return %arg0, %arg1 : i32, i32
  }
}

</mosaic_0001>

<bundles_post_ra>
// kernel: tpu_custom_call.1
= control target key start
LH: loop header
LB: loop body
LE: loop exit
PB: predicated region body
PF: predicated region fallthrough
CT: control target
= control target key end

     0   :  { %8 = vsyncpa [#allocation3], 0  ;;  %s307_s0 = inlined_call_operand.hbm [shape: bf16[16,32], index: 0, kind: input, shape index: {}]   ;;  %s308_s1 = inlined_call_operand.hbm [shape: bf16[32,128], index: 1, kind: input, shape index: {}]   ;;  %s309_s2 = inlined_call_operand.vmem [shape: f32[1,128], index: 2, kind: input, shape index: {}]   ;;  %s310_s3 = inlined_call_operand.hbm [shape: f32[16,128], index: 3, kind: output, shape index: {}]  }
   0x1   :  { %9 = vsyncpa [#allocation6], 0 }
   0x2   :  { %10 = vsyncpa [#allocation4], 0  ;;  %s239_s12 = smov [#allocation2]   ;;  %s167_s16 = scalar_lea.hbm %s307_s0, 128 }
   0x3   :  { %s16_s13 = sshll.u32 %s239_s12, 4  ;;  %p168_p0 = scmp.ne.s32.totalorder %s307_s0, %s167_s16  ;;  %s17_s13 = int_to_ptr.vmem [resolvable:$true] %s16_s13 }
   0x4   :  { %p171_p1 = scmp.lt.u32.totalorder %s167_s16, %s307_s0 }
   0x6   :  { %p173_p2 = pnand %p171_p1, %p168_p0 }
   0x8   :  { %176 = shalt.err (!%p173_p2)
}
   0x9   :  { %s177_s21 = scalar_lea.vmem %s17_s13, 128  ;;  %p182_p4 = scmp.lt.s32.totalorder %s17_s13, %s17_s13 }
   0xa   :  { %p178_p3 = scmp.ne.s32.totalorder %s17_s13, %s177_s21  ;;  %p183_p5 = scmp.lt.s32.totalorder %s177_s21, %s177_s21 }
   0xc   :  { %p184_p6 = por %p183_p5, %p182_p4 }
   0xe   :  { %p185_p7 = pnand %p184_p6, %p178_p3 }
  0x10   :  { %188 = shalt.err (!%p185_p7)
}
  0x11   :  { %s240_s22 = smov 64   ;;  %s241_s23 = smov 4  }
  0x12   :  { %22 = dma.hbm_to_vmem [thread:$0]  %s307_s0, 128, %s17_s13, [#allocation3], %s240_s22, %s240_s22, %s241_s23  }
  0x13   :  { %s242_s26 = smov [#allocation5]   ;;  %s189_s30 = scalar_lea.hbm %s308_s1, 256 }
  0x14   :  { %s28_s27 = sshll.u32 %s242_s26, 4  ;;  %p190_p8 = scmp.ne.s32.totalorder %s308_s1, %s189_s30  ;;  %s29_s27 = int_to_ptr.vmem [resolvable:$true] %s28_s27 }
  0x15   :  { %p193_p9 = scmp.lt.u32.totalorder %s189_s30, %s308_s1 }
  0x17   :  { %p195_p10 = pnand %p193_p9, %p190_p8 }
  0x19   :  { %198 = shalt.err (!%p195_p10)
}
  0x1a   :  { %s199_s8 = scalar_lea.vmem %s29_s27, 256  ;;  %p204_p12 = scmp.lt.s32.totalorder %s29_s27, %s29_s27 }
  0x1b   :  { %p200_p11 = scmp.ne.s32.totalorder %s29_s27, %s199_s8  ;;  %p205_p13 = scmp.lt.s32.totalorder %s199_s8, %s199_s8 }
  0x1d   :  { %p206_p0 = por %p205_p13, %p204_p12 }
  0x1f   :  { %p207_p1 = pnand %p206_p0, %p200_p11 }
  0x21   :  { %210 = shalt.err (!%p207_p1)
}
  0x22   :  { %34 = dma.hbm_to_vmem [thread:$0]  %s308_s1, 256, %s29_s27, [#allocation6], %s240_s22, %s240_s22, %s241_s23  }
  0x23   :  { %233 = dma.done.wait [#allocation3], 128  }
  0x24   :  { %234 = vsyncadd [#allocation3], 4294967168 }
  0x25   :  { %235 = dma.done.wait [#allocation6], 256  }
  0x26   :  { %236 = vsyncadd [#allocation6], 4294967040  ;;  %v243_v0 = vmov 0.0   ;;  %vm244_vm0 = vmmov 0   ;;  %v164_v1 = vld [vmem:[#allocation5] sm:$0xff]   ;;  %v165_v2 = vld [vmem:[#allocation5 + $0x8] sm:$0xff]  }
  0x27   :  { %147 = vmatprep.subr.bf16.mxu0 %v243_v0  ;;  %151 = vmatprep.mubr.msk.bf16.mxu0 %vm244_vm0, %v243_v0  ;;  %v166_v3 = vld [vmem:[#allocation2] sm:$0xff]   ;;  %vm74_vm1 = vcmask 261120   ;;  %s245_s1 = smov [#allocation7]  }
  0x28   :  { %148 = vmatpush3.bf16.msra.mxu0 %v164_v1  ;;  %v139_v4 = vld [vmem:[%s309_s2] ss:$0 sm:$0xff]  ;;  %s126_s12 = sshll.u32 %s245_s1, 4  ;;  %s127_s12 = int_to_ptr.vmem [resolvable:$true] %s126_s12 }
  0x29   :  { %149 = vmatprep.subr.bf16.mxu0 %v243_v0  ;;  %s211_s13 = scalar_lea.vmem %s127_s12, 256  ;;  %p216_p3 = scmp.lt.s32.totalorder %s127_s12, %s127_s12 }
  0x2a   :  { %p212_p2 = scmp.ne.s32.totalorder %s127_s12, %s211_s13  ;;  %p217_p4 = scmp.lt.s32.totalorder %s211_s13, %s211_s13 }
  0x2c   :  { %150 = vmatpush3.bf16.msra.mxu0 %v165_v2  ;;  %p218_p5 = por %p217_p4, %p216_p3 }
  0x2e   :  { %p219_p6 = pnand %p218_p5, %p212_p2 }
  0x2f   :  { %152 = vmatmul.mubr.msk.bf16.vlgmr.msra.gmra.mrb[0].mxu0 %vm74_vm1, %v166_v3 }
 0x102   :  { %v112_v5 = vpop.f32.mrb[0].mxu0 }
 0x103   :  { %v113_v6 = vadd.f32 %v139_v4, %v112_v5  ;;  %v153_v7 = vpop.f32.mrb[1].mxu0 }
 0x104   :  { %v115_v8 = vpop.f32.mrb[2].mxu0 }
 0x105   :  { %119 = vst [vmem:[#allocation7] sm:$0xff] %v113_v6  ;;  %v116_v9 = vadd.f32 %v139_v4, %v115_v8  ;;  %v154_v10 = vpop.f32.mrb[3].mxu0 }
 0x107   :  { %120 = vst [vmem:[#allocation7 + $0x8] sm:$0xff] %v116_v9 }
 0x108   :  { %222 = shalt.err (!%p219_p6)
}
 0x109   :  { %s223_s15 = scalar_lea.hbm %s310_s3, 256 }
 0x10a   :  { %p224_p7 = scmp.ne.s32.totalorder %s310_s3, %s223_s15  ;;  %p227_p8 = scmp.lt.u32.totalorder %s223_s15, %s310_s3 }
 0x10c   :  { %p229_p9 = pnand %p227_p8, %p224_p7 }
 0x10e   :  { %232 = shalt.err (!%p229_p9)
}
 0x10f   :  { %s246_s20 = smov 128   ;;  %s247_s21 = smov 8  }
 0x110   :  { %132 = dma.vmem_to_hbm [thread:$0]  %s127_s12, 256, %s310_s3, [#allocation4], %s246_s20, %s246_s20, %s247_s21  }
 0x111   :  { %237 = dma.done.wait [#allocation4], 256  }
 0x112   :  { %238 = vsyncadd [#allocation4], 4294967040 }
 0x113   :  { %136 = vsyncpa [#allocation3], 1 }
 0x114   :  { %137 = vsyncpa [#allocation6], 1 }
 0x115   :  { %138 = vsyncpa [#allocation4], 1 }

</bundles_post_ra>
